<compile_context>
chip_gen: v5e
topology: v5e:2x2
jax: 0.10.0
libtpu: 0.0.40
codegen_flags: <defaults>
</compile_context>

<pallas_src>
import jax
import jax.numpy as jnp
from jax import lax
from jax.experimental import pallas as pl
from jax.experimental.pallas import tpu as pltpu


# ----------------------------- Pallas kernel --------------------------------
def resnet_head_kernel(x_ref, w_ref, b_ref, pool_ref, out_ref):
    """One batch tile (BT elements) per grid step.

    x_ref    : (BT*49, 9*CIN)   im2col rows for BT batch elements (f32 or bf16)
    w_ref    : (9*CIN, N_PAD)   fused [actor | critic | 0-pad] conv weight
    b_ref    : (1, N_PAD)       fused conv bias (f32, pad lanes are 0)
    pool_ref : (BT, BT*49)      constant 7x7 avg-pool matrix (1/49 entries, f32)
    out_ref  : (BT, N_PAD)      pooled [actor | critic | 0-pad] heads (f32)
    """
    # conv-as-matmul for both heads at once: M = BT*49, K = 9*CIN, N = N_PAD.
    y = jnp.dot(x_ref[...], w_ref[...], preferred_element_type=jnp.float32)
    y = jnp.maximum(y + b_ref[...], 0.0)                 # bias + ReLU (VPU, f32)
    # 7x7 average pool folded into one small f32 matmul (no reshapes).
    out_ref[...] = jnp.dot(pool_ref[...], y, preferred_element_type=jnp.float32)


# ----------------------------- JAX wrapper -----------------------------------
def _round_up(x, m):
    return ((x + m - 1) // m) * m


def resnet_base_forward(master_features_nchw, actions_memory, params, num_skills,
                        *, compute_dtype=jnp.float32, bt_max=64):
    """compute_dtype=jnp.bfloat16 is an optional accuracy/perf trade for
    v6e/v7x (weights + im2col cast to bf16, f32 MXU accumulation); keep the
    f32 default on v5e."""
    assert num_skills > 1, "num_skills must be > 1 (memory normalization)"
    B, CIN, H, W = master_features_nchw.shape
    assert H == 7 and W == 7, "ResnetBase conv head expects 7x7 spatial features"
    K = 3
    HW = H * W                                   # 49
    KKCIN = K * K * CIN
    COUT = params['w_actor'].shape[0]            # torch conv weight (COUT, CIN, K, K)
    A = actions_memory.shape[1]
    N_PAD = max(128, _round_up(2 * COUT, 128))   # lane-dense output width
    assert 2 * COUT <= N_PAD

    # batch tile: multiple of 8 sublanes, capped; pad batch to a multiple of BT.
    BT = min(bt_max, _round_up(B, 8))
    B_pad = _round_up(B, BT)
    grid_len = B_pad // BT

    # --- glue (XLA): NCHW -> NHWC, zero pad, im2col ---------------------------
    feat = jnp.transpose(master_features_nchw, (0, 2, 3, 1)).astype(jnp.float32)
    xp = jnp.pad(feat, ((0, 0), (1, 1), (1, 1), (0, 0)))          # (B, 9, 9, CIN)
    # tap order (kh, kw, cin) matches the weight reshape below
    patches = [xp[:, kh:kh + H, kw:kw + W, :]
               for kh in range(K) for kw in range(K)]             # each (B,7,7,CIN)
    im2 = jnp.concatenate(patches, axis=-1).reshape(B, HW, KKCIN)
    if B_pad > B:
        im2 = jnp.pad(im2, ((0, B_pad - B), (0, 0), (0, 0)))
    im2 = im2.reshape(B_pad * HW, KKCIN).astype(compute_dtype)    # contiguous im2col

    # fused [actor | critic] conv weight, N padded to N_PAD with zeros
    def to_mat(w_torch):                          # (COUT,CIN,K,K) -> (K*K*CIN, COUT)
        return jnp.transpose(w_torch, (2, 3, 1, 0)).reshape(KKCIN, COUT)

    w_fused = jnp.concatenate([to_mat(params['w_actor']),
                               to_mat(params['w_critic'])], axis=1)
    w_fused = jnp.pad(w_fused, ((0, 0), (0, N_PAD - 2 * COUT))).astype(compute_dtype)
    b_fused = jnp.concatenate([params['b_actor'], params['b_critic']])
    b_fused = jnp.pad(b_fused, (0, N_PAD - 2 * COUT)).reshape(1, N_PAD)
    b_fused = b_fused.astype(jnp.float32)

    # constant 7x7 average-pool matrix (1/49 on each element's 49 rows)
    rows = jnp.arange(BT)[:, None]
    cols = jnp.arange(BT * HW)[None, :] // HW
    pool_mat = jnp.where(rows == cols, 1.0 / float(HW), 0.0).astype(jnp.float32)

    out = pl.pallas_call(
        resnet_head_kernel,
        out_shape=jax.ShapeDtypeStruct((B_pad, N_PAD), jnp.float32),
        grid=(grid_len,),
        in_specs=[
            pl.BlockSpec((BT * HW, KKCIN), lambda i: (i, 0)),     # im2col tile
            pl.BlockSpec((KKCIN, N_PAD), lambda i: (0, 0)),       # resident weight
            pl.BlockSpec((1, N_PAD), lambda i: (0, 0)),           # resident bias
            pl.BlockSpec((BT, BT * HW), lambda i: (0, 0)),        # resident pool mat
        ],
        out_specs=pl.BlockSpec((BT, N_PAD), lambda i: (i, 0)),
        compiler_params=pltpu.CompilerParams(
            dimension_semantics=("parallel",)),   # v7x: 2 TCs split the batch tiles
    )(im2, w_fused, b_fused, pool_mat)

    pooled = out[:B]                                              # (B, N_PAD)
    pa = pooled[:, :COUT]                                         # pooled actor head
    pc = pooled[:, COUT:2 * COUT]                                 # pooled critic head

    # actions_memory normalization, concat, critic_linear — cheap XLA-fused ops
    mem_s = 2.0 * actions_memory.astype(jnp.float32) / (num_skills - 1.0) - 1.0
    hidden_actor = jnp.concatenate([pa, mem_s], axis=1)           # (B, COUT + A)
    hidden_critic = jnp.concatenate([pc, mem_s], axis=1)
    value = hidden_critic @ params['w_lin'].T + params['b_lin']   # (B, 1)
    return value, hidden_actor


# ----------------------------- reference (pure JAX) ---------------------------
def reference_forward(master_features_nchw, actions_memory, params, num_skills):
    feat = jnp.transpose(master_features_nchw, (0, 2, 3, 1)).astype(jnp.float32)

    def head(w, b):
        w_hwio = jnp.transpose(w, (2, 3, 1, 0))
        y = lax.conv_general_dilated(feat, w_hwio, (1, 1), 'SAME',
                                     dimension_numbers=('NHWC', 'HWIO', 'NHWC'))
        y = jnp.maximum(y + b[None, None, None, :], 0.0)
        return jnp.mean(y, axis=(1, 2))

    pa = head(params['w_actor'], params['b_actor'])
    pc = head(params['w_critic'], params['b_critic'])
    mem_s = 2.0 * actions_memory / (num_skills - 1.0) - 1.0
    ha = jnp.concatenate([pa, mem_s], axis=1)
    hc = jnp.concatenate([pc, mem_s], axis=1)
    val = hc @ params['w_lin'].T + params['b_lin']
    return val, ha


# ----------------------------- parameter init ---------------------------------
def init_params(key, cin, cout, action_memory, K=3):
    k1, k2, k3 = jax.random.split(key, 3)
    return {
        'w_actor': 0.1 * jax.random.normal(k1, (cout, cin, K, K), jnp.float32),
        'w_critic': 0.1 * jax.random.normal(k2, (cout, cin, K, K), jnp.float32),
        'b_actor': jnp.zeros((cout,), jnp.float32),
        'b_critic': jnp.zeros((cout,), jnp.float32),
        # critic_linear: orthogonal weight, zero bias (as in misc.init)
        'w_lin': jax.nn.initializers.orthogonal()(k3, (1, cout + action_memory),
                                                  jnp.float32),
        'b_lin': jnp.zeros((1,), jnp.float32),
    }


if __name__ == "__main__":
    # small, forward-consistent shapes
    B = 2              # batch
    CIN = 8            # bc_args['features_dim'] (resnet feature channels)
    H = W = 7          # forward asserts 7x7 spatial features
    COUT = 32          # master_num_channels (hidden_size)
    NUM_SKILLS = 4     # len(skills_mapping)
    ACTION_MEMORY = 2  # action_memory

    key = jax.random.PRNGKey(0)
    kf, km, kp = jax.random.split(key, 3)

    master_features = jax.random.normal(kf, (B, CIN, H, W), jnp.float32)  # NCHW
    actions_memory = jax.random.randint(km, (B, ACTION_MEMORY), 0,
                                        NUM_SKILLS).astype(jnp.float32)
    params = init_params(kp, CIN, COUT, ACTION_MEMORY)

    val_ref, act_ref = reference_forward(master_features, actions_memory,
                                         params, NUM_SKILLS)

    # f32 path (tight check)
    value, hidden_actor = resnet_base_forward(master_features, actions_memory,
                                              params, NUM_SKILLS)
    jax.block_until_ready((value, hidden_actor))
    assert value.shape == (B, 1)
    assert hidden_actor.shape == (B, COUT + ACTION_MEMORY)
    assert jnp.allclose(value, val_ref, atol=1e-4, rtol=1e-4)
    assert jnp.allclose(hidden_actor, act_ref, atol=1e-4, rtol=1e-4)

    # bf16-activation/weight path (v6e/v7x option; f32 accumulate).
    # NOTE: weights are cast too -> this is an accuracy/perf trade, hence the
    # loose tolerance (not a bug).
    value16, hidden16 = resnet_base_forward(master_features, actions_memory,
                                            params, NUM_SKILLS,
                                            compute_dtype=jnp.bfloat16)
    jax.block_until_ready((value16, hidden16))
    assert jnp.allclose(value16, val_ref, atol=5e-2, rtol=5e-2)
    assert jnp.allclose(hidden16, act_ref, atol=5e-2, rtol=5e-2)

    print("KERNEL_OK")
</pallas_src>

<mosaic_0001>
module attributes {stable_mosaic.version = 11 : i64} {
  func.func @resnet_head_kernel(%arg0: i32, %arg1: memref<392x72xf32, #tpu.memory_space<vmem>>, %arg2: memref<72x128xf32, #tpu.memory_space<vmem>>, %arg3: memref<1x128xf32, #tpu.memory_space<vmem>>, %arg4: memref<8x392xf32, #tpu.memory_space<vmem>>, %arg5: memref<8x128xf32, #tpu.memory_space<vmem>>) attributes {dimension_semantics = [#tpu.dimension_semantics<parallel>], iteration_bounds = array<i64: 1>, scalar_prefetch = 0 : i64, scratch_operands = 0 : i64, tpu.core_type = #tpu.core_type<tc>, window_params = [{transform_indices = @transform_0, window_bounds = array<i64: 392, 72>}, {pipeline_mode = #tpu.pipeline_mode<synchronous>, transform_indices = @transform_1, window_bounds = array<i64: 72, 128>}, {pipeline_mode = #tpu.pipeline_mode<synchronous>, transform_indices = @transform_2, window_bounds = array<i64: 1, 128>}, {pipeline_mode = #tpu.pipeline_mode<synchronous>, transform_indices = @transform_3, window_bounds = array<i64: 8, 392>}, {transform_indices = @transform_4, window_bounds = array<i64: 8, 128>}]} {
    %c0 = arith.constant 0 : index
    %c0_0 = arith.constant 0 : index
    %0 = vector.load %arg1[%c0, %c0_0] : memref<392x72xf32, #tpu.memory_space<vmem>>, vector<392x72xf32>
    %c0_1 = arith.constant 0 : index
    %c0_2 = arith.constant 0 : index
    %1 = vector.load %arg2[%c0_1, %c0_2] : memref<72x128xf32, #tpu.memory_space<vmem>>, vector<72x128xf32>
    %cst = arith.constant dense<0.000000e+00> : vector<392x128xf32>
    %2 = tpu.matmul %0, %1, %cst {dimension_numbers = #tpu.dot_dimension_numbers<[1], [0], [0], [1], [0, 0, 1, 1], [], []>} : vector<392x72xf32>, vector<72x128xf32>, vector<392x128xf32> -> vector<392x128xf32>
    %c0_3 = arith.constant 0 : index
    %c0_4 = arith.constant 0 : index
    %3 = vector.load %arg3[%c0_3, %c0_4] : memref<1x128xf32, #tpu.memory_space<vmem>>, vector<1x128xf32>
    %4 = vector.broadcast %3 : vector<1x128xf32> to vector<392x128xf32>
    %5 = arith.addf %2, %4 : vector<392x128xf32>
    %cst_5 = arith.constant 0.000000e+00 : f32
    %6 = vector.broadcast %cst_5 : f32 to vector<392x128xf32>
    %7 = arith.maximumf %5, %6 : vector<392x128xf32>
    %c0_6 = arith.constant 0 : index
    %c0_7 = arith.constant 0 : index
    %8 = vector.load %arg4[%c0_6, %c0_7] : memref<8x392xf32, #tpu.memory_space<vmem>>, vector<8x392xf32>
    %cst_8 = arith.constant dense<0.000000e+00> : vector<8x128xf32>
    %9 = tpu.matmul %8, %7, %cst_8 {dimension_numbers = #tpu.dot_dimension_numbers<[1], [0], [0], [1], [0, 0, 1, 1], [], []>} : vector<8x392xf32>, vector<392x128xf32>, vector<8x128xf32> -> vector<8x128xf32>
    %c0_9 = arith.constant 0 : index
    %c0_10 = arith.constant 0 : index
    %10 = vector.load %arg5[%c0_9, %c0_10] : memref<8x128xf32, #tpu.memory_space<vmem>>, vector<8x128xf32>
    tpu.vector_store %arg5[%c0_9, %c0_10], %9 {strides = array<i32>} : memref<8x128xf32, #tpu.memory_space<vmem>>, vector<8x128xf32>,
    return
  }
  func.func @transform_0(%arg0: i32) -> (i32, i32) {
    %c0_i32 = arith.constant 0 : i32
    %c0_i32_0 = arith.constant 0 : i32
    return %arg0, %c0_i32 : i32, i32
  }
  func.func @transform_1(%arg0: i32) -> (i32, i32) {
    %c0_i32 = arith.constant 0 : i32
    %c0_i32_0 = arith.constant 0 : i32
    %c0_i32_1 = arith.constant 0 : i32
    return %c0_i32, %c0_i32_0 : i32, i32
  }
  func.func @transform_2(%arg0: i32) -> (i32, i32) {
    %c0_i32 = arith.constant 0 : i32
    %c0_i32_0 = arith.constant 0 : i32
    %c0_i32_1 = arith.constant 0 : i32
    return %c0_i32, %c0_i32_0 : i32, i32
  }
  func.func @transform_3(%arg0: i32) -> (i32, i32) {
    %c0_i32 = arith.constant 0 : i32
    %c0_i32_0 = arith.constant 0 : i32
    %c0_i32_1 = arith.constant 0 : i32
    return %c0_i32, %c0_i32_0 : i32, i32
  }
  func.func @transform_4(%arg0: i32) -> (i32, i32) {
    %c0_i32 = arith.constant 0 : i32
    %c0_i32_0 = arith.constant 0 : i32
    return %arg0, %c0_i32 : i32, i32
  }
}

</mosaic_0001>

<bundles_post_ra>
// kernel: tpu_custom_call.1
= control target key start
LH: loop header
LB: loop body
LE: loop exit
PB: predicated region body
PF: predicated region fallthrough
CT: control target
= control target key end

     0   :  { %s1041_s0 = inlined_call_operand.vmem [shape: f32[392,72], index: 0, kind: input, shape index: {}]   ;;  %s1042_s1 = inlined_call_operand.vmem [shape: f32[72,128], index: 1, kind: input, shape index: {}]   ;;  %s1043_s2 = inlined_call_operand.vmem [shape: f32[1,128], index: 2, kind: input, shape index: {}]   ;;  %s1044_s3 = inlined_call_operand.vmem [shape: f32[8,392], index: 3, kind: input, shape index: {}]   ;;  %s1045_s4 = inlined_call_operand.hbm [shape: f32[8,128], index: 4, kind: output, shape index: {}]  }
   0x1   :  { %v75_v0 = vld [vmem:[%s1042_s1 + $0x40] sm:$0xff]  ;;  %v74_v1 = vld [vmem:[%s1042_s1 + $0x38] sm:$0xff]  ;;  %v73_v2 = vld [vmem:[%s1042_s1 + $0x30] sm:$0xff] }
   0x2   :  { %235 = vmatpush.msra.mxu0 %v75_v0  ;;  %597 = vmatpush.msra.mxu2 %v75_v0  ;;  %v72_v3 = vld [vmem:[%s1042_s1 + $0x28] sm:$0xff]  ;;  %v71_v4 = vld [vmem:[%s1042_s1 + $0x20] sm:$0xff] }
   0x3   :  { %598 = vmatpush.msra.mxu3 %v75_v0  ;;  %596 = vmatpush.msra.mxu1 %v75_v0 }
   0x4   :  { %236 = vmatpush.msra.mxu0 %v74_v1  ;;  %600 = vmatpush.msra.mxu2 %v74_v1 }
   0x5   :  { %601 = vmatpush.msra.mxu3 %v74_v1  ;;  %599 = vmatpush.msra.mxu1 %v74_v1 }
   0x6   :  { %237 = vmatpush.msra.mxu0 %v73_v2  ;;  %603 = vmatpush.msra.mxu2 %v73_v2 }
   0x7   :  { %604 = vmatpush.msra.mxu3 %v73_v2  ;;  %602 = vmatpush.msra.mxu1 %v73_v2 }
   0x8   :  { %9 = vsyncpa [#allocation3], 0  ;;  %238 = vmatpush.msra.mxu0 %v72_v3  ;;  %606 = vmatpush.msra.mxu2 %v72_v3  ;;  %v70_v5 = vld [vmem:[%s1042_s1 + $0x18] sm:$0xff]  ;;  %v69_v6 = vld [vmem:[%s1042_s1 + $0x10] sm:$0xff]  ;;  %vm80_vm0 = vcmask 588800   ;;  %vm445_vm1 = vcmask 64512  }
   0x9   :  { %607 = vmatpush.msra.mxu3 %v72_v3  ;;  %605 = vmatpush.msra.mxu1 %v72_v3  ;;  %v68_v7 = vld [vmem:[%s1042_s1 + $0x8] sm:$0xff]  ;;  %v67_v8 = vld [vmem:[%s1042_s1] sm:$0xff]  ;;  %v41_v10 = vld [vmem:[%s1041_s0 + $0xb8] sm:$0xff]  ;;  %s651_s5 = smov [#allocation2]   ;;  %s537_s9 = sshll.u32 %s1045_s4, 4  ;;  %s538_s9 = int_to_ptr.hbm [resolvable:$true] %s537_s9 }
   0xa   :  { %239 = vmatpush.msra.mxu0 %v71_v4  ;;  %609 = vmatpush.msra.mxu2 %v71_v4  ;;  %v18_v9 = vld [vmem:[%s1041_s0] sm:$0xff]  ;;  %v33_v12 = vld [vmem:[%s1041_s0 + $0x78] sm:$0xff]  ;;  %v19_v13 = vld [vmem:[%s1041_s0 + $0x8] sm:$0xff]  ;;  %s535_s6 = sshll.u32 %s651_s5, 4  ;;  %s536_s6 = int_to_ptr.vmem [resolvable:$true] %s535_s6 }
   0xb   :  { %610 = vmatpush.msra.mxu3 %v71_v4  ;;  %608 = vmatpush.msra.mxu1 %v71_v4  ;;  %v54_v11 = vld [vmem:[%s1041_s0 + $0x120] sm:$0xff]  ;;  %v55_v15 = vld [vmem:[%s1041_s0 + $0x128] sm:$0xff]  ;;  %v20_v17 = vld [vmem:[%s1041_s0 + $0x10] sm:$0xff] }
   0xc   :  { %240 = vmatpush.msra.mxu0 %v70_v5  ;;  %612 = vmatpush.msra.mxu2 %v70_v5  ;;  %v42_v14 = vld [vmem:[%s1041_s0 + $0xc0] sm:$0xff]  ;;  %v43_v18 = vld [vmem:[%s1041_s0 + $0xc8] sm:$0xff]  ;;  %v56_v19 = vld [vmem:[%s1041_s0 + $0x130] sm:$0xff] }
   0xd   :  { %613 = vmatpush.msra.mxu3 %v70_v5  ;;  %611 = vmatpush.msra.mxu1 %v70_v5  ;;  %v34_v16 = vld [vmem:[%s1041_s0 + $0x80] sm:$0xff]  ;;  %v35_v20 = vld [vmem:[%s1041_s0 + $0x88] sm:$0xff]  ;;  %v21_v21 = vld [vmem:[%s1041_s0 + $0x18] sm:$0xff] }
   0xe   :  { %241 = vmatpush.msra.mxu0 %v69_v6  ;;  %615 = vmatpush.msra.mxu2 %v69_v6  ;;  %v44_v22 = vld [vmem:[%s1041_s0 + $0xd0] sm:$0xff]  ;;  %v57_v23 = vld [vmem:[%s1041_s0 + $0x138] sm:$0xff]  ;;  %v22_v25 = vld [vmem:[%s1041_s0 + $0x20] sm:$0xff] }
   0xf   :  { %616 = vmatpush.msra.mxu3 %v69_v6  ;;  %614 = vmatpush.msra.mxu1 %v69_v6  ;;  %v36_v24 = vld [vmem:[%s1041_s0 + $0x90] sm:$0xff]  ;;  %v45_v26 = vld [vmem:[%s1041_s0 + $0xd8] sm:$0xff]  ;;  %v58_v27 = vld [vmem:[%s1041_s0 + $0x140] sm:$0xff] }
  0x10   :  { %242 = vmatpush.msra.mxu0 %v68_v7  ;;  %618 = vmatpush.msra.mxu2 %v68_v7  ;;  %v37_v28 = vld [vmem:[%s1041_s0 + $0x98] sm:$0xff]  ;;  %v23_v29 = vld [vmem:[%s1041_s0 + $0x28] sm:$0xff]  ;;  %v46_v30 = vld [vmem:[%s1041_s0 + $0xe0] sm:$0xff] }
  0x11   :  { %619 = vmatpush.msra.mxu3 %v68_v7  ;;  %617 = vmatpush.msra.mxu1 %v68_v7  ;;  %v59_v31 = vld [vmem:[%s1041_s0 + $0x148] sm:$0xff]  ;;  %v38_v32 = vld [vmem:[%s1041_s0 + $0xa0] sm:$0xff]  ;;  %v24_v33 = vld [vmem:[%s1041_s0 + $0x30] sm:$0xff] }
  0x12   :  { %243 = vmatpush.msra.mxu0 %v67_v8  ;;  %621 = vmatpush.msra.mxu2 %v67_v8  ;;  %v47_v34 = vld [vmem:[%s1041_s0 + $0xe8] sm:$0xff]  ;;  %v60_v35 = vld [vmem:[%s1041_s0 + $0x150] sm:$0xff]  ;;  %v25_v37 = vld [vmem:[%s1041_s0 + $0x38] sm:$0xff] }
  0x13   :  { %622 = vmatpush.msra.mxu3 %v67_v8  ;;  %546 = vmatmul.msk.f32.vlgmr.msra.gmra.mxu0 %vm80_vm0, %v18_v9  ;;  %v39_v36 = vld [vmem:[%s1041_s0 + $0xa8] sm:$0xff]  ;;  %v48_v38 = vld [vmem:[%s1041_s0 + $0xf0] sm:$0xff]  ;;  %v61_v39 = vld [vmem:[%s1041_s0 + $0x158] sm:$0xff] }
  0x14   :  { %569 = vmatmul.msk.f32.vlgmr.msra.gmra.mxu2 %vm80_vm0, %v41_v10  ;;  %582 = vmatmul.msk.f32.vlgmr.msra.gmra.mxu3 %vm80_vm0, %v54_v11  ;;  %v40_v40 = vld [vmem:[%s1041_s0 + $0xb0] sm:$0xff]  ;;  %v26_v41 = vld [vmem:[%s1041_s0 + $0x40] sm:$0xff]  ;;  %v49_v42 = vld [vmem:[%s1041_s0 + $0xf8] sm:$0xff] }
  0x15   :  { %620 = vmatpush.msra.mxu1 %v67_v8  ;;  %v62_v43 = vld [vmem:[%s1041_s0 + $0x160] sm:$0xff]  ;;  %v27_v44 = vld [vmem:[%s1041_s0 + $0x48] sm:$0xff]  ;;  %v28_v47 = vld [vmem:[%s1041_s0 + $0x50] sm:$0xff] }
  0x16   :  { %561 = vmatmul.msk.f32.vlgmr.msra.gmra.mxu1 %vm80_vm0, %v33_v12  ;;  %v63_v45 = vld [vmem:[%s1041_s0 + $0x168] sm:$0xff]  ;;  %v50_v46 = vld [vmem:[%s1041_s0 + $0x100] sm:$0xff]  ;;  %v64_v48 = vld [vmem:[%s1041_s0 + $0x170] sm:$0xff] }
  0x17   :  { %v51_v49 = vld [vmem:[%s1041_s0 + $0x108] sm:$0xff]  ;;  %v29_v50 = vld [vmem:[%s1041_s0 + $0x58] sm:$0xff]  ;;  %v52_v52 = vld [vmem:[%s1041_s0 + $0x110] sm:$0xff] }
  0x18   :  { %v65_v51 = vld [vmem:[%s1041_s0 + $0x178] sm:$0xff]  ;;  %v30_v53 = vld [vmem:[%s1041_s0 + $0x60] sm:$0xff]  ;;  %v31_v55 = vld [vmem:[%s1041_s0 + $0x68] sm:$0xff] }
  0x19   :  { %v53_v54 = vld [vmem:[%s1041_s0 + $0x118] sm:$0xff]  ;;  %v32_v56 = vld [vmem:[%s1041_s0 + $0x70] sm:$0xff]  ;;  %v66_v57 = vld [vmem:[%s1041_s0 + $0x180] sm:$0xff] }
  0x1a   :  { %v905_v59 = vld [vmem:[%s1043_s2] ss:$0 sm:$0xff] }
  0x1b   :  { %547 = vmatmul.msk.f32.gmra.mxu0 %vm80_vm0, %v19_v13 }
  0x1c   :  { %570 = vmatmul.msk.f32.gmra.mxu2 %vm80_vm0, %v42_v14  ;;  %583 = vmatmul.msk.f32.gmra.mxu3 %vm80_vm0, %v55_v15 }
  0x1e   :  { %562 = vmatmul.msk.f32.gmra.mxu1 %vm80_vm0, %v34_v16 }
  0x23   :  { %548 = vmatmul.msk.f32.gmra.mxu0 %vm80_vm0, %v20_v17 }
  0x24   :  { %571 = vmatmul.msk.f32.gmra.mxu2 %vm80_vm0, %v43_v18  ;;  %584 = vmatmul.msk.f32.gmra.mxu3 %vm80_vm0, %v56_v19 }
  0x26   :  { %563 = vmatmul.msk.f32.gmra.mxu1 %vm80_vm0, %v35_v20 }
  0x2b   :  { %549 = vmatmul.msk.f32.gmra.mxu0 %vm80_vm0, %v21_v21 }
  0x2c   :  { %572 = vmatmul.msk.f32.gmra.mxu2 %vm80_vm0, %v44_v22  ;;  %585 = vmatmul.msk.f32.gmra.mxu3 %vm80_vm0, %v57_v23 }
  0x2e   :  { %564 = vmatmul.msk.f32.gmra.mxu1 %vm80_vm0, %v36_v24 }
  0x33   :  { %550 = vmatmul.msk.f32.gmra.mxu0 %vm80_vm0, %v22_v25 }
  0x34   :  { %573 = vmatmul.msk.f32.gmra.mxu2 %vm80_vm0, %v45_v26  ;;  %586 = vmatmul.msk.f32.gmra.mxu3 %vm80_vm0, %v58_v27 }
  0x36   :  { %565 = vmatmul.msk.f32.gmra.mxu1 %vm80_vm0, %v37_v28 }
  0x3b   :  { %551 = vmatmul.msk.f32.gmra.mxu0 %vm80_vm0, %v23_v29 }
  0x3c   :  { %574 = vmatmul.msk.f32.gmra.mxu2 %vm80_vm0, %v46_v30  ;;  %587 = vmatmul.msk.f32.gmra.mxu3 %vm80_vm0, %v59_v31 }
  0x3e   :  { %566 = vmatmul.msk.f32.gmra.mxu1 %vm80_vm0, %v38_v32 }
  0x43   :  { %552 = vmatmul.msk.f32.gmra.mxu0 %vm80_vm0, %v24_v33 }
  0x44   :  { %575 = vmatmul.msk.f32.gmra.mxu2 %vm80_vm0, %v47_v34  ;;  %588 = vmatmul.msk.f32.gmra.mxu3 %vm80_vm0, %v60_v35 }
  0x46   :  { %567 = vmatmul.msk.f32.gmra.mxu1 %vm80_vm0, %v39_v36 }
  0x4b   :  { %553 = vmatmul.msk.f32.gmra.mxu0 %vm80_vm0, %v25_v37 }
  0x4c   :  { %576 = vmatmul.msk.f32.gmra.mxu2 %vm80_vm0, %v48_v38  ;;  %589 = vmatmul.msk.f32.gmra.mxu3 %vm80_vm0, %v61_v39 }
  0x4e   :  { %568 = vmatmul.msk.f32.gmra.mxu1 %vm80_vm0, %v40_v40 }
  0x53   :  { %554 = vmatmul.msk.f32.gmra.mxu0 %vm80_vm0, %v26_v41 }
  0x54   :  { %577 = vmatmul.msk.f32.gmra.mxu2 %vm80_vm0, %v49_v42  ;;  %590 = vmatmul.msk.f32.gmra.mxu3 %vm80_vm0, %v62_v43 }
  0x5b   :  { %555 = vmatmul.msk.f32.gmra.mxu0 %vm80_vm0, %v27_v44 }
  0x5c   :  { %591 = vmatmul.msk.f32.gmra.mxu3 %vm80_vm0, %v63_v45  ;;  %578 = vmatmul.msk.f32.gmra.mxu2 %vm80_vm0, %v50_v46 }
  0x63   :  { %556 = vmatmul.msk.f32.gmra.mxu0 %vm80_vm0, %v28_v47 }
  0x64   :  { %592 = vmatmul.msk.f32.gmra.mxu3 %vm80_vm0, %v64_v48  ;;  %579 = vmatmul.msk.f32.gmra.mxu2 %vm80_vm0, %v51_v49 }
  0x6b   :  { %557 = vmatmul.msk.f32.gmra.mxu0 %vm80_vm0, %v29_v50 }
  0x6c   :  { %593 = vmatmul.msk.f32.gmra.mxu3 %vm80_vm0, %v65_v51  ;;  %580 = vmatmul.msk.f32.gmra.mxu2 %vm80_vm0, %v52_v52 }
  0x73   :  { %558 = vmatmul.msk.f32.gmra.mxu0 %vm80_vm0, %v30_v53 }
  0x74   :  { %581 = vmatmul.msk.f32.gmra.mxu2 %vm80_vm0, %v53_v54  ;;  %594 = vmatmul.msk.f32.gmra.mxu3 %vm80_vm0, %v66_v57 }
  0x7b   :  { %559 = vmatmul.msk.f32.gmra.mxu0 %vm80_vm0, %v31_v55 }
  0x83   :  { %560 = vmatmul.msk.f32.gmra.mxu0 %vm80_vm0, %v32_v56 }
  0x90   :  { %v900_v58 = vpop.f32.mrf.mxu0 }
  0x93   :  { %v290_v60 = vpop.f32.mrf.mxu1 }
  0x94   :  { %v291_v61 = vadd.f32 %v905_v59, %v290_v60 }
  0x96   :  { %v407_v62 = vmax.f32 %v291_v61, 0.0 }
  0x97   :  { %v314_v63 = vpop.f32.mrf.mxu2  ;;  %v908_v0 = vpop.f32.mrf.mxu3 }
  0x98   :  { %v910_v1 = vpop.f32.mrf.mxu0  ;;  %449 = vmatpush.msrb.mxu1 %v407_v62  ;;  %v315_v50 = vadd.f32 %v905_v59, %v314_v63 }
  0x9a   :  { %v415_v57 = vmax.f32 %v315_v50, 0.0 }
  0x9b   :  { %v916_v5 = vpop.f32.mrf.mxu1 }
  0x9f   :  { %v317_v2 = vpop.f32.mrf.mxu2  ;;  %v912_v3 = vpop.f32.mrf.mxu3 }
  0xa0   :  { %v914_v4 = vpop.f32.mrf.mxu0  ;;  %v318_v48 = vadd.f32 %v905_v59, %v317_v2 }
  0xa2   :  { %v416_v54 = vmax.f32 %v318_v48, 0.0 }
  0xa3   :  { %v926_v12 = vpop.f32.mrf.mxu1 }
  0xa7   :  { %v320_v6 = vpop.f32.mrf.mxu2  ;;  %v918_v7 = vpop.f32.mrf.mxu3 }
  0xa8   :  { %v920_v8 = vpop.f32.mrf.mxu0  ;;  %v321_v44 = vadd.f32 %v905_v59, %v320_v6 }
  0xaa   :  { %v417_v51 = vmax.f32 %v321_v44, 0.0  ;;  %v442_v44 = vld [vmem:[%s1044_s3 + $0x8] sm:$0xff] }
  0xab   :  { %v299_v16 = vpop.f32.mrf.mxu1 }
  0xaf   :  { %v323_v9 = vpop.f32.mrf.mxu2  ;;  %v922_v10 = vpop.f32.mrf.mxu3 }
  0xb0   :  { %v924_v11 = vpop.f32.mrf.mxu0  ;;  %v324_v42 = vadd.f32 %v905_v59, %v323_v9 }
  0xb2   :  { %v418_v49 = vmax.f32 %v324_v42, 0.0 }
  0xb3   :  { %v302_v20 = vpop.f32.mrf.mxu1 }
  0xb4   :  { %v303_v62 = vadd.f32 %v905_v59, %v302_v20 }
  0xb7   :  { %v326_v13 = vpop.f32.mrf.mxu2  ;;  %v928_v14 = vpop.f32.mrf.mxu3 }
  0xb8   :  { %v930_v15 = vpop.f32.mrf.mxu0  ;;  %v327_v39 = vadd.f32 %v905_v59, %v326_v13 }
  0xba   :  { %v419_v45 = vmax.f32 %v327_v39, 0.0 }
  0xbb   :  { %v305_v24 = vpop.f32.mrf.mxu1 }
  0xbc   :  { %v306_v60 = vadd.f32 %v905_v59, %v305_v24  ;;  %v297_v24 = vadd.f32 %v905_v59, %v926_v12 }
  0xbe   :  { %v412_v6 = vmax.f32 %v306_v60, 0.0 }
  0xbf   :  { %v329_v17 = vpop.f32.mrf.mxu2  ;;  %v932_v18 = vpop.f32.mrf.mxu3 }
  0xc0   :  { %v934_v19 = vpop.f32.mrf.mxu0  ;;  %v330_v35 = vadd.f32 %v905_v59, %v329_v17  ;;  %v300_v17 = vadd.f32 %v905_v59, %v299_v16  ;;  %v409_v16 = vmax.f32 %v297_v24, 0.0 }
  0xc2   :  { %v420_v40 = vmax.f32 %v330_v35, 0.0 }
  0xc3   :  { %v308_v34 = vpop.f32.mrf.mxu1 }
  0xc4   :  { %v309_v55 = vadd.f32 %v905_v59, %v308_v34  ;;  %v410_v34 = vmax.f32 %v300_v17, 0.0 }
  0xc6   :  { %v413_v2 = vmax.f32 %v309_v55, 0.0 }
  0xc7   :  { %v332_v21 = vpop.f32.mrf.mxu2  ;;  %v936_v22 = vpop.f32.mrf.mxu3 }
  0xc8   :  { %v938_v23 = vpop.f32.mrf.mxu0  ;;  %v333_v31 = vadd.f32 %v905_v59, %v332_v21  ;;  %v411_v21 = vmax.f32 %v303_v62, 0.0  ;;  %v372_v39 = vadd.f32 %v905_v59, %v936_v22  ;;  %v363_v22 = vadd.f32 %v905_v59, %v922_v10 }
  0xca   :  { %v421_v38 = vmax.f32 %v333_v31, 0.0  ;;  %v434_v42 = vmax.f32 %v372_v39, 0.0 }
  0xcb   :  { %v311_v46 = vpop.f32.mrf.mxu1 }
  0xcc   :  { %v312_v52 = vadd.f32 %v905_v59, %v311_v46 }
  0xce   :  { %v414_v61 = vmax.f32 %v312_v52, 0.0  ;;  %v431_v52 = vmax.f32 %v363_v22, 0.0 }
  0xcf   :  { %v335_v25 = vpop.f32.mrf.mxu2  ;;  %v940_v26 = vpop.f32.mrf.mxu3 }
  0xd0   :  { %v942_v27 = vpop.f32.mrf.mxu0  ;;  %v336_v28 = vadd.f32 %v905_v59, %v335_v25 }
  0xd2   :  { %v422_v36 = vmax.f32 %v336_v28, 0.0 }
  0xd7   :  { %v338_v29 = vpop.f32.mrf.mxu2  ;;  %v377_v30 = vpop.f32.mrf.mxu3 }
  0xd8   :  { %v339_v32 = vadd.f32 %v905_v59, %v338_v29  ;;  %v947_v33 = vpop.f32.mrf.mxu0  ;;  %v378_v35 = vadd.f32 %v905_v59, %v377_v30  ;;  %v369_v30 = vadd.f32 %v905_v59, %v932_v18  ;;  %v360_v18 = vadd.f32 %v905_v59, %v918_v7 }
  0xda   :  { %v423_v37 = vmax.f32 %v339_v32, 0.0  ;;  %v294_v32 = vadd.f32 %v905_v59, %v916_v5  ;;  %v430_v7 = vmax.f32 %v360_v18, 0.0 }
  0xdc   :  { %469 = vmatpush.msrb.mxu2 %v423_v37 }
  0xde   :  { %470 = vmatpush.msrb.mxu2 %v422_v36  ;;  %v375_v36 = vadd.f32 %v905_v59, %v940_v26  ;;  %v366_v26 = vadd.f32 %v905_v59, %v928_v14 }
  0xdf   :  { %v380_v41 = vpop.f32.mrf.mxu3  ;;  %v955_v47 = vpop.f32.mrf.mxu2 }
  0xe0   :  { %471 = vmatpush.msrb.mxu2 %v421_v38  ;;  %v952_v43 = vpop.f32.mrf.mxu0  ;;  %v381_v20 = vadd.f32 %v905_v59, %v380_v41  ;;  %v408_v38 = vmax.f32 %v294_v32, 0.0  ;;  %v435_v41 = vmax.f32 %v375_v36, 0.0  ;;  %v432_v46 = vmax.f32 %v366_v26, 0.0 }
  0xe1   :  { %v276_v62 = vadd.f32 %v905_v59, %v952_v43  ;;  %v342_v43 = vadd.f32 %v905_v59, %v955_v47  ;;  %v261_v47 = vadd.f32 %v905_v59, %v930_v15  ;;  %v249_v36 = vadd.f32 %v905_v59, %v910_v1 }
  0xe2   :  { %472 = vmatpush.msrb.mxu2 %v420_v40  ;;  %v437_v37 = vmax.f32 %v381_v20, 0.0  ;;  %v436_v40 = vmax.f32 %v378_v35, 0.0  ;;  %v252_v35 = vadd.f32 %v905_v59, %v914_v4 }
  0xe4   :  { %473 = vmatpush.msrb.mxu2 %v419_v45  ;;  %v433_v45 = vmax.f32 %v369_v30, 0.0 }
  0xe6   :  { %474 = vmatpush.msrb.mxu2 %v418_v49 }
  0xe7   :  { %v383_v53 = vpop.f32.mrf.mxu3  ;;  %v965_v63 = vpop.f32.mrf.mxu2 }
  0xe8   :  { %475 = vmatpush.msrb.mxu2 %v417_v51  ;;  %v961_v56 = vpop.f32.mrf.mxu0  ;;  %v384_v9 = vadd.f32 %v905_v59, %v383_v53  ;;  %v357_v51 = vadd.f32 %v905_v59, %v912_v3 }
  0xea   :  { %476 = vmatpush.msrb.mxu2 %v416_v54  ;;  %v438_v29 = vmax.f32 %v384_v9, 0.0  ;;  %v354_v54 = vadd.f32 %v905_v59, %v908_v0  ;;  %v273_v9 = vadd.f32 %v905_v59, %v947_v33 }
  0xec   :  { %477 = vmatpush.msrb.mxu2 %v415_v57  ;;  %v279_v57 = vadd.f32 %v905_v59, %v961_v56  ;;  %v345_v56 = vadd.f32 %v905_v59, %v965_v63  ;;  %v401_v33 = vmax.f32 %v273_v9, 0.0  ;;  %v264_v63 = vadd.f32 %v905_v59, %v934_v19 }
  0xed   :  { %v255_v19 = vadd.f32 %v905_v59, %v920_v8 }
  0xee   :  { %478 = vmatpush.msrb.mxu2 %v414_v61  ;;  %v429_v61 = vmax.f32 %v357_v51, 0.0  ;;  %v425_v24 = vmax.f32 %v345_v56, 0.0  ;;  %v398_v32 = vmax.f32 %v264_v63, 0.0 }
  0xef   :  { %v386_v13 = vpop.f32.mrf.mxu3  ;;  %v347_v12 = vpop.f32.mrf.mxu2 }
  0xf0   :  { %v387_v25 = vadd.f32 %v905_v59, %v386_v13  ;;  %v281_v28 = vpop.f32.mrf.mxu0  ;;  %479 = vmatpush.msrb.mxu2 %v413_v2  ;;  %v348_v3 = vadd.f32 %v905_v59, %v347_v12  ;;  %v403_v13 = vmax.f32 %v279_v57, 0.0  ;;  %v394_v12 = vmax.f32 %v252_v35, 0.0 }
  0xf1   :  { %v282_v10 = vadd.f32 %v905_v59, %v281_v28  ;;  %v267_v28 = vadd.f32 %v905_v59, %v938_v23  ;;  %v258_v23 = vadd.f32 %v905_v59, %v924_v11  ;;  %v246_v11 = vadd.f32 %v905_v59, %v900_v58  ;;  %v444_v58 = vld [vmem:[%s1044_s3 + $0x18] sm:$0xff] }
  0xf2   :  { %v439_v31 = vmax.f32 %v387_v25, 0.0  ;;  %480 = vmatpush.msrb.mxu2 %v412_v6  ;;  %v428_v6 = vmax.f32 %v354_v54, 0.0  ;;  %v426_v17 = vmax.f32 %v348_v3, 0.0  ;;  %v402_v25 = vmax.f32 %v276_v62, 0.0 }
  0xf3   :  { %v404_v2 = vmax.f32 %v282_v10, 0.0  ;;  %v392_v39 = vmax.f32 %v246_v11, 0.0 }
  0xf4   :  { %489 = vmatpush.msrb.mxu3 %v439_v31  ;;  %481 = vmatpush.msrb.mxu2 %v411_v21  ;;  %v270_v21 = vadd.f32 %v905_v59, %v942_v27  ;;  %v443_v27 = vld [vmem:[%s1044_s3 + $0x10] sm:$0xff]  ;;  %v399_v31 = vmax.f32 %v267_v28, 0.0 }
  0xf6   :  { %490 = vmatpush.msrb.mxu3 %v438_v29  ;;  %482 = vmatpush.msrb.mxu2 %v410_v34  ;;  %v400_v20 = vmax.f32 %v270_v21, 0.0  ;;  %v424_v29 = vmax.f32 %v342_v43, 0.0  ;;  %v397_v34 = vmax.f32 %v261_v47, 0.0 }
  0xf7   :  { %v350_v50 = vpop.f32.mrf.mxu2  ;;  %v389_v15 = vpop.f32.mrf.mxu3 }
  0xf8   :  { %491 = vmatpush.msrb.mxu3 %v437_v37  ;;  %v284_v5 = vpop.f32.mrf.mxu0  ;;  %483 = vmatpush.msrb.mxu2 %v409_v16  ;;  %v351_v55 = vadd.f32 %v905_v59, %v350_v50  ;;  %v396_v16 = vmax.f32 %v258_v23, 0.0  ;;  %v395_v37 = vmax.f32 %v255_v19, 0.0  ;;  %v390_v8 = vadd.f32 %v905_v59, %v389_v15 }
  0xf9   :  { %v285_v14 = vadd.f32 %v905_v59, %v284_v5 }
  0xfa   :  { %492 = vmatpush.msrb.mxu3 %v436_v40  ;;  %484 = vmatpush.msrb.mxu2 %v408_v38  ;;  %v427_v0 = vmax.f32 %v351_v55, 0.0  ;;  %v393_v38 = vmax.f32 %v249_v36, 0.0  ;;  %v440_v4 = vmax.f32 %v390_v8, 0.0  ;;  %v441_v40 = vld [vmem:[%s1044_s3] sm:$0xff] }
  0xfb   :  { %485 = vmatmul.f32.vlgmr.msrb.gmra.mxu2 %v442_v44  ;;  %v405_v60 = vmax.f32 %v285_v14, 0.0 }
  0xfc   :  { %493 = vmatpush.msrb.mxu3 %v435_v41 }
  0xfe   :  { %494 = vmatpush.msrb.mxu3 %v434_v42 }
 0x100   :  { %495 = vmatpush.msrb.mxu3 %v433_v45  ;;  %v287_v48 = vpop.f32.mrf.mxu0 }
 0x101   :  { %v288_v49 = vadd.f32 %v905_v59, %v287_v48 }
 0x102   :  { %496 = vmatpush.msrb.mxu3 %v432_v46 }
 0x103   :  { %v406_v53 = vmax.f32 %v288_v49, 0.0 }
 0x104   :  { %497 = vmatpush.msrb.mxu3 %v431_v52 }
 0x105   :  { %450 = vmatpush.msrb.mxu1 %v406_v53 }
 0x106   :  { %498 = vmatpush.msrb.mxu3 %v430_v7 }
 0x107   :  { %451 = vmatpush.msrb.mxu1 %v405_v60 }
 0x108   :  { %499 = vmatpush.msrb.mxu3 %v429_v61 }
 0x109   :  { %452 = vmatpush.msrb.mxu1 %v404_v2 }
 0x10a   :  { %500 = vmatpush.msrb.mxu3 %v428_v6 }
 0x10b   :  { %453 = vmatpush.msrb.mxu1 %v403_v13 }
 0x10c   :  { %501 = vmatpush.msrb.mxu3 %v427_v0 }
 0x10d   :  { %454 = vmatpush.msrb.mxu1 %v402_v25 }
 0x10e   :  { %502 = vmatpush.msrb.mxu3 %v426_v17 }
 0x10f   :  { %455 = vmatpush.msrb.mxu1 %v401_v33 }
 0x110   :  { %503 = vmatpush.msrb.mxu3 %v425_v24 }
 0x111   :  { %456 = vmatpush.msrb.mxu1 %v400_v20 }
 0x112   :  { %504 = vmatpush.msrb.mxu3 %v424_v29 }
 0x113   :  { %457 = vmatpush.msrb.mxu1 %v399_v31  ;;  %505 = vmatmul.f32.vlgmr.msrb.gmra.mxu3 %v443_v27 }
 0x115   :  { %458 = vmatpush.msrb.mxu1 %v398_v32 }
 0x117   :  { %459 = vmatpush.msrb.mxu1 %v397_v34 }
 0x119   :  { %460 = vmatpush.msrb.mxu1 %v396_v16 }
 0x11b   :  { %461 = vmatpush.msrb.mxu1 %v395_v37 }
 0x11d   :  { %462 = vmatpush.msrb.mxu1 %v394_v12 }
 0x11f   :  { %463 = vmatpush.msrb.mxu1 %v393_v38 }
 0x121   :  { %464 = vmatpush.msrb.mxu1 %v392_v39 }
 0x122   :  { %465 = vmatmul.f32.vlgmr.msrb.gmra.mxu1 %v441_v40 }
 0x123   :  { %524 = vmatpush.msra.mxu1 %v440_v4 }
 0x12a   :  { %595 = vmatmul.msk.f32.vlgmr.msra.gmra.mxu1 %vm445_vm1, %v444_v58 }
 0x17e   :  { %v486_v59 = vpop.f32.mrf.mxu2 }
 0x196   :  { %v506_v30 = vpop.f32.mrf.mxu3 }
 0x19f   :  { %v466_v1 = vpop.f32.mrf.mxu1 }
 0x1a0   :  { %v487_v5 = vadd.f32 %v486_v59, %v466_v1 }
 0x1a2   :  { %v507_v41 = vadd.f32 %v506_v30, %v487_v5 }
 0x1a7   :  { %v526_v26 = vpop.f32.mrf.mxu1 }
 0x1a8   :  { %v527_v42 = vadd.f32 %v526_v26, %v507_v41 }
 0x1aa   :  { %529 = vst [vmem:[#allocation2] sm:$0xff] %v527_v42 }
 0x1ab   :  { %540 = dma.vmem_to_hbm [thread:$0]  %s536_s6, 128, %s538_s9, [#allocation3]  }
 0x1ac   :  { %649 = dma.done.wait [#allocation3], 128  }
 0x1ad   :  { %650 = vsyncadd [#allocation3], 4294967168 }
 0x1ae   :  { %545 = vsyncpa [#allocation3], 1 }

</bundles_post_ra>
